<compile_context>
chip_gen: v7x
topology: tpu7x:2x2x1
jax: 0.10.0
libtpu: 0.0.40
codegen_flags: <defaults>
</compile_context>

<pallas_src>
import jax
import jax.numpy as jnp
from jax import lax
from jax.experimental import pallas as pl
from jax.experimental.pallas import tpu as pltpu


def _pow_norm(deg, p):
    """deg ** p with cheap special cases (deg already clamped >= 1)."""
    if p == -0.5:
        return lax.rsqrt(deg)
    if p == -1.0:
        return 1.0 / deg
    if p == 0.5:
        return jnp.sqrt(deg)
    if p == 1.0:
        return deg
    if p == 0.0:
        return jnp.ones_like(deg)
    return jnp.power(deg, p)


def _pick_tile(dim, pref=512):
    """Largest multiple of 128 that divides `dim` and is <= pref (else full dim)."""
    if dim % 128 != 0:
        return dim  # full-extent block is always legal
    t = max(128, (min(pref, dim) // 128) * 128)
    while dim % t != 0:
        t -= 128
    return t


def _mp_kernel(adj_t_ref, x_ref, norm_out_ref, norm_in_ref, o_ref):
    # grid = (dst tiles j, feature tiles f, source reduction tiles k)
    # The f32 output block stays resident in VMEM across the k axis, so we
    # accumulate directly into it (no scratch, no final copy).
    k = pl.program_id(2)

    @pl.when(k == 0)
    def _():
        o_ref[...] = jnp.zeros_like(o_ref)

    # adj is {0,1}: bf16 -> f32 cast is exact; standard last-dim contraction.
    adj_t = adj_t_ref[...].astype(jnp.float32)            # [TJ, TK]
    feat_src = x_ref[...] * norm_out_ref[...]             # [TK, TF] * [TK, 1]
    o_ref[...] += jnp.dot(adj_t, feat_src,
                          preferred_element_type=jnp.float32)

    @pl.when(k == pl.num_programs(2) - 1)
    def _():
        o_ref[...] *= norm_in_ref[...]                    # [TJ, TF] * [TJ, 1]


def message_passing(adj, x, m=-0.5, n=-0.5, *, tj=None, tf=None, tk=None):
    """Non-parametrized GCN-style message passing on a dense adjacency."""
    N, F = x.shape
    assert adj.shape == (N, N)

    adj = adj.astype(jnp.float32)
    x = x.astype(jnp.float32)

    # Full-graph degree norms precomputed once (stay correct under K-tiling).
    out_deg = jnp.maximum(jnp.sum(adj, axis=1), 1.0)
    in_deg = jnp.maximum(jnp.sum(adj, axis=0), 1.0)
    norm_out = _pow_norm(out_deg, m)[:, None].astype(jnp.float32)  # [N, 1]
    norm_in = _pow_norm(in_deg, n)[:, None].astype(jnp.float32)    # [N, 1]

    # Pre-transpose + narrow the adjacency stream (exact for {0,1}).
    adj_t = adj.T.astype(jnp.bfloat16)                              # [N, N]

    tj = tj or _pick_tile(N)
    tk = tk or _pick_tile(N)
    tf = tf or _pick_tile(F)
    assert N % tj == 0 and N % tk == 0 and F % tf == 0

    grid = (N // tj, F // tf, N // tk)

    cost = pl.CostEstimate(
        flops=2 * N * N * F,
        transcendentals=0,
        bytes_accessed=adj_t.size * 2 + x.size * 4 + 2 * N * 4 + N * F * 4,
    )

    return pl.pallas_call(
        _mp_kernel,
        out_shape=jax.ShapeDtypeStruct((N, F), jnp.float32),
        grid_spec=pltpu.PrefetchScalarGridSpec(
            num_scalar_prefetch=0,
            grid=grid,
            in_specs=[
                pl.BlockSpec((tj, tk), lambda j, f, k: (j, k)),   # adj^T tile
                pl.BlockSpec((tk, tf), lambda j, f, k: (k, f)),   # x tile
                pl.BlockSpec((tk, 1), lambda j, f, k: (k, 0)),    # out_deg^m
                pl.BlockSpec((tj, 1), lambda j, f, k: (j, 0)),    # in_deg^n
            ],
            out_specs=pl.BlockSpec((tj, tf), lambda j, f, k: (j, f)),
        ),
        compiler_params=pltpu.CompilerParams(
            dimension_semantics=("parallel", "parallel", "arbitrary"),
            vmem_limit_bytes=32 * 1024 * 1024,   # well under v7x's 64 MiB
        ),
        cost_estimate=cost,
    )(adj_t, x, norm_out, norm_in)


def _reference(adj, x, m=-0.5, n=-0.5):
    out_deg = jnp.maximum(adj.sum(axis=1), 1.0)
    feat_src = x * (out_deg ** m)[:, None]
    rst = adj.T @ feat_src
    in_deg = jnp.maximum(adj.sum(axis=0), 1.0)
    return rst * (in_deg ** n)[:, None]


if __name__ == "__main__":
    N, F = 256, 128
    key = jax.random.PRNGKey(0)
    k_adj, k_x = jax.random.split(key)

    # deterministic random directed graph (layer has no parameters)
    adj = jax.random.bernoulli(k_adj, p=0.1, shape=(N, N)).astype(jnp.float32)
    x = jax.random.normal(k_x, (N, F), dtype=jnp.float32)

    # default (largest-fitting) tiles -> single-step reduction
    out = jax.block_until_ready(message_passing(adj, x))
    # force a multi-step reduction grid to exercise the accumulator path
    out_tiled = jax.block_until_ready(
        message_passing(adj, x, tj=128, tf=128, tk=128))
    # non-default normalization exponents
    out_mn = jax.block_until_ready(message_passing(adj, x, m=-1.0, n=0.0))

    ref = _reference(adj, x)
    ref_mn = _reference(adj, x, m=-1.0, n=0.0)
    assert out.shape == (N, F) and out.dtype == jnp.float32
    assert jnp.allclose(out, ref, atol=1e-4, rtol=1e-4)
    assert jnp.allclose(out_tiled, ref, atol=1e-4, rtol=1e-4)
    assert jnp.allclose(out_mn, ref_mn, atol=1e-4, rtol=1e-4)
    print("KERNEL_OK")
</pallas_src>

<mosaic_0001>
module attributes {stable_mosaic.version = 11 : i64} {
  func.func @_mp_kernel(%arg0: i32, %arg1: i32, %arg2: i32, %arg3: memref<256x256xbf16, #tpu.memory_space<vmem>>, %arg4: memref<256x128xf32, #tpu.memory_space<vmem>>, %arg5: memref<256x1xf32, #tpu.memory_space<vmem>>, %arg6: memref<256x1xf32, #tpu.memory_space<vmem>>, %arg7: memref<256x128xf32, #tpu.memory_space<vmem>>) attributes {dimension_semantics = [#tpu.dimension_semantics<parallel>, #tpu.dimension_semantics<parallel>, #tpu.dimension_semantics<arbitrary>], iteration_bounds = array<i64: 1, 1, 1>, scalar_prefetch = 0 : i64, scratch_operands = 0 : i64, tpu.core_type = #tpu.core_type<tc>, window_params = [{transform_indices = @transform_0, window_bounds = array<i64: 256, 256>}, {transform_indices = @transform_1, window_bounds = array<i64: 256, 128>}, {transform_indices = @transform_2, window_bounds = array<i64: 256, 1>}, {transform_indices = @transform_3, window_bounds = array<i64: 256, 1>}, {transform_indices = @transform_4, window_bounds = array<i64: 256, 128>}]} {
    %c0_i32 = arith.constant 0 : i32
    %0 = arith.cmpi eq, %arg2, %c0_i32 : i32
    %1 = arith.extui %0 : i1 to i32
    %c0_i32_0 = arith.constant 0 : i32
    %2 = arith.cmpi ne, %1, %c0_i32_0 : i32
    scf.if %2 {
      %cst_12 = arith.constant 0.000000e+00 : f32
      %16 = vector.broadcast %cst_12 : f32 to vector<256x128xf32>
      %c0_13 = arith.constant 0 : index
      %c0_14 = arith.constant 0 : index
      %17 = vector.load %arg7[%c0_13, %c0_14] : memref<256x128xf32, #tpu.memory_space<vmem>>, vector<256x128xf32>
      tpu.vector_store %arg7[%c0_13, %c0_14], %16 {strides = array<i32>} : memref<256x128xf32, #tpu.memory_space<vmem>>, vector<256x128xf32>,
    } else {
    }
    %c0 = arith.constant 0 : index
    %c0_1 = arith.constant 0 : index
    %3 = vector.load %arg3[%c0, %c0_1] : memref<256x256xbf16, #tpu.memory_space<vmem>>, vector<256x256xbf16>
    %4 = arith.extf %3 : vector<256x256xbf16> to vector<256x256xf32>
    %c0_2 = arith.constant 0 : index
    %c0_3 = arith.constant 0 : index
    %5 = vector.load %arg4[%c0_2, %c0_3] : memref<256x128xf32, #tpu.memory_space<vmem>>, vector<256x128xf32>
    %c0_4 = arith.constant 0 : index
    %c0_5 = arith.constant 0 : index
    %6 = vector.load %arg5[%c0_4, %c0_5] : memref<256x1xf32, #tpu.memory_space<vmem>>, vector<256x1xf32>
    %7 = vector.broadcast %6 : vector<256x1xf32> to vector<256x128xf32>
    %8 = arith.mulf %5, %7 : vector<256x128xf32>
    %c0_6 = arith.constant 0 : index
    %c0_7 = arith.constant 0 : index
    %9 = vector.load %arg7[%c0_6, %c0_7] : memref<256x128xf32, #tpu.memory_space<vmem>>, vector<256x128xf32>
    %cst = arith.constant dense<0.000000e+00> : vector<256x128xf32>
    %10 = tpu.matmul %4, %8, %cst {dimension_numbers = #tpu.dot_dimension_numbers<[1], [0], [0], [1], [0, 0, 1, 1], [], []>} : vector<256x256xf32>, vector<256x128xf32>, vector<256x128xf32> -> vector<256x128xf32>
    %11 = arith.addf %9, %10 : vector<256x128xf32>
    %c0_8 = arith.constant 0 : index
    %c0_9 = arith.constant 0 : index
    %12 = vector.load %arg7[%c0_8, %c0_9] : memref<256x128xf32, #tpu.memory_space<vmem>>, vector<256x128xf32>
    tpu.vector_store %arg7[%c0_8, %c0_9], %11 {strides = array<i32>} : memref<256x128xf32, #tpu.memory_space<vmem>>, vector<256x128xf32>,
    %c0_i32_10 = arith.constant 0 : i32
    %13 = arith.cmpi eq, %arg2, %c0_i32_10 : i32
    %14 = arith.extui %13 : i1 to i32
    %c0_i32_11 = arith.constant 0 : i32
    %15 = arith.cmpi ne, %14, %c0_i32_11 : i32
    scf.if %15 {
      %c0_12 = arith.constant 0 : index
      %c0_13 = arith.constant 0 : index
      %16 = vector.load %arg7[%c0_12, %c0_13] : memref<256x128xf32, #tpu.memory_space<vmem>>, vector<256x128xf32>
      %c0_14 = arith.constant 0 : index
      %c0_15 = arith.constant 0 : index
      %17 = vector.load %arg6[%c0_14, %c0_15] : memref<256x1xf32, #tpu.memory_space<vmem>>, vector<256x1xf32>
      %18 = vector.broadcast %17 : vector<256x1xf32> to vector<256x128xf32>
      %19 = arith.mulf %16, %18 : vector<256x128xf32>
      %c0_16 = arith.constant 0 : index
      %c0_17 = arith.constant 0 : index
      %20 = vector.load %arg7[%c0_16, %c0_17] : memref<256x128xf32, #tpu.memory_space<vmem>>, vector<256x128xf32>
      tpu.vector_store %arg7[%c0_16, %c0_17], %19 {strides = array<i32>} : memref<256x128xf32, #tpu.memory_space<vmem>>, vector<256x128xf32>,
    } else {
    }
    return
  }
  func.func @transform_0(%arg0: i32, %arg1: i32, %arg2: i32) -> (i32, i32) {
    %c0_i32 = arith.constant 0 : i32
    return %arg0, %arg2 : i32, i32
  }
  func.func @transform_1(%arg0: i32, %arg1: i32, %arg2: i32) -> (i32, i32) {
    %c0_i32 = arith.constant 0 : i32
    return %arg2, %arg1 : i32, i32
  }
  func.func @transform_2(%arg0: i32, %arg1: i32, %arg2: i32) -> (i32, i32) {
    %c0_i32 = arith.constant 0 : i32
    %c0_i32_0 = arith.constant 0 : i32
    return %arg2, %c0_i32 : i32, i32
  }
  func.func @transform_3(%arg0: i32, %arg1: i32, %arg2: i32) -> (i32, i32) {
    %c0_i32 = arith.constant 0 : i32
    %c0_i32_0 = arith.constant 0 : i32
    return %arg0, %c0_i32 : i32, i32
  }
  func.func @transform_4(%arg0: i32, %arg1: i32, %arg2: i32) -> (i32, i32) {
    %c0_i32 = arith.constant 0 : i32
    return %arg0, %arg1 : i32, i32
  }
}

</mosaic_0001>

<bundles_post_ra>
// kernel: tpu_custom_call.1
= control target key start
LH: loop header
LB: loop body
LE: loop exit
PB: predicated region body
PF: predicated region fallthrough
CT: control target
= control target key end

     0   :  { %v1146_v2 = vmov 0   ;;  %v1147_v7 = vmov 0.0|0.0   ;;  %s1642_s0 = inlined_call_operand.vmem [shape: bf16[256,256], index: 0, kind: input, shape index: {}]   ;;  %s1643_s1 = inlined_call_operand.vmem [shape: f32[256,128], index: 1, kind: input, shape index: {}]   ;;  %s1644_s2 = inlined_call_operand.vmem [shape: f32[256,1], index: 2, kind: input, shape index: {}]   ;;  %s1645_s3 = inlined_call_operand.vmem [shape: f32[256,1], index: 3, kind: input, shape index: {}]   ;;  %s1646_s4 = inlined_call_operand.hbm [shape: f32[256,128], index: 4, kind: output, shape index: {}]  }
   0x1   :  { %v184_v0 = vld [vmem:[%s1644_s2 + $0x10] sm:$0xff]  ;;  %v182_v1 = vld [vmem:[%s1644_s2] sm:$0xff]  ;;  %1121 = vset.pattern.permute.xlu1 %v1146_v2  ;;  %1120 = vset.pattern.permute.xlu0 %v1146_v2  ;;  %v185_v3 = vld [vmem:[%s1644_s2 + $0x18] sm:$0xff] }
   0x2   :  { %226 = vperm.xlu1 %1121, %v184_v0   ;;  %216 = vperm.xlu0 %1120, %v182_v1   ;;  %v183_v4 = vld [vmem:[%s1644_s2 + $0x8] sm:$0xff]  ;;  %v186_v6 = vld [vmem:[%s1644_s2 + $0x20] sm:$0xff]  ;;  %v189_v8 = vld [vmem:[%s1644_s2 + $0x38] sm:$0xff] }
   0x3   :  { %v187_v5 = vld [vmem:[%s1644_s2 + $0x28] sm:$0xff]  ;;  %1034 = vmatprep.subr.bf16.mxu0 %v1147_v7  ;;  %1082 = vmatprep.subr.bf16.mxu1 %v1147_v7  ;;  %v188_v9 = vld [vmem:[%s1644_s2 + $0x30] sm:$0xff]  ;;  %v190_v11 = vld [vmem:[%s1644_s2 + $0x40] sm:$0xff] }
   0x4   :  { %v191_v10 = vld [vmem:[%s1644_s2 + $0x48] sm:$0xff]  ;;  %v193_v12 = vld [vmem:[%s1644_s2 + $0x58] sm:$0xff]  ;;  %v192_v13 = vld [vmem:[%s1644_s2 + $0x50] sm:$0xff] }
   0x5   :  { %v195_v14 = vld [vmem:[%s1644_s2 + $0x68] sm:$0xff]  ;;  %v194_v15 = vld [vmem:[%s1644_s2 + $0x60] sm:$0xff] }
   0x6   :  { %231 = vperm.xlu1 %1121, %v185_v3   ;;  %221 = vperm.xlu0 %1120, %v183_v4  }
   0xa   :  { %241 = vperm.xlu1 %1121, %v187_v5   ;;  %236 = vperm.xlu0 %1120, %v186_v6  }
   0xe   :  { %251 = vperm.xlu1 %1121, %v189_v8   ;;  %246 = vperm.xlu0 %1120, %v188_v9  }
  0x12   :  { %261 = vperm.xlu1 %1121, %v191_v10   ;;  %256 = vperm.xlu0 %1120, %v190_v11  }
  0x16   :  { %271 = vperm.xlu1 %1121, %v193_v12   ;;  %266 = vperm.xlu0 %1120, %v192_v13  }
  0x1a   :  { %281 = vperm.xlu1 %1121, %v195_v14   ;;  %276 = vperm.xlu0 %1120, %v194_v15  }
  0x1b   :  { %9 = vsyncpa [#allocation3], 0  ;;  %v197_v16 = vld [vmem:[%s1644_s2 + $0x78] sm:$0xff]  ;;  %v196_v17 = vld [vmem:[%s1644_s2 + $0x70] sm:$0xff] }
  0x1c   :  { %v199_v18 = vld [vmem:[%s1644_s2 + $0x88] sm:$0xff]  ;;  %v198_v19 = vld [vmem:[%s1644_s2 + $0x80] sm:$0xff]  ;;  %v201_v20 = vld [vmem:[%s1644_s2 + $0x98] sm:$0xff] }
  0x1d   :  { %v200_v21 = vld [vmem:[%s1644_s2 + $0x90] sm:$0xff]  ;;  %v203_v22 = vld [vmem:[%s1644_s2 + $0xa8] sm:$0xff]  ;;  %v202_v23 = vld [vmem:[%s1644_s2 + $0xa0] sm:$0xff] }
  0x1e   :  { %291 = vperm.xlu1 %1121, %v197_v16   ;;  %286 = vperm.xlu0 %1120, %v196_v17   ;;  %v205_v24 = vld [vmem:[%s1644_s2 + $0xb8] sm:$0xff]  ;;  %v204_v25 = vld [vmem:[%s1644_s2 + $0xb0] sm:$0xff]  ;;  %v207_v26 = vld [vmem:[%s1644_s2 + $0xc8] sm:$0xff] }
  0x1f   :  { %v206_v27 = vld [vmem:[%s1644_s2 + $0xc0] sm:$0xff]  ;;  %v209_v28 = vld [vmem:[%s1644_s2 + $0xd8] sm:$0xff]  ;;  %v208_v29 = vld [vmem:[%s1644_s2 + $0xd0] sm:$0xff] }
  0x20   :  { %v211_v30 = vld [vmem:[%s1644_s2 + $0xe8] sm:$0xff]  ;;  %v210_v31 = vld [vmem:[%s1644_s2 + $0xe0] sm:$0xff]  ;;  %v213_v32 = vld [vmem:[%s1644_s2 + $0xf8] sm:$0xff] }
  0x21   :  { %v212_v33 = vld [vmem:[%s1644_s2 + $0xf0] sm:$0xff]  ;;  %v763_v34 = vld [vmem:[%s1645_s3 + $0x8] sm:$0xff]  ;;  %v762_v35 = vld [vmem:[%s1645_s3] sm:$0xff] }
  0x22   :  { %301 = vperm.xlu1 %1121, %v199_v18   ;;  %296 = vperm.xlu0 %1120, %v198_v19   ;;  %v765_v36 = vld [vmem:[%s1645_s3 + $0x18] sm:$0xff]  ;;  %v764_v37 = vld [vmem:[%s1645_s3 + $0x10] sm:$0xff]  ;;  %v1289_v38 = vld [vmem:[%s1642_s0] sm:$0xff] }
  0x23   :  { %v1294_v39 = vld [vmem:[%s1642_s0 + $0x80] sm:$0xff]  ;;  %v87_v40 = vunpack.c.h.bf16 %v1289_v38  ;;  %v767_v42 = vld [vmem:[%s1645_s3 + $0x28] sm:$0xff]  ;;  %v769_v44 = vld [vmem:[%s1645_s3 + $0x38] sm:$0xff] }
  0x24   :  { %v119_v41 = vunpack.c.h.bf16 %v1294_v39  ;;  %v766_v43 = vld [vmem:[%s1645_s3 + $0x20] sm:$0xff]  ;;  %v768_v45 = vld [vmem:[%s1645_s3 + $0x30] sm:$0xff]  ;;  %v771_v46 = vld [vmem:[%s1645_s3 + $0x48] sm:$0xff] }
  0x25   :  { %502 = vmatprep.mubr.f32.mxu0 %v87_v40  ;;  %v770_v47 = vld [vmem:[%s1645_s3 + $0x40] sm:$0xff]  ;;  %v773_v48 = vld [vmem:[%s1645_s3 + $0x58] sm:$0xff]  ;;  %v772_v49 = vld [vmem:[%s1645_s3 + $0x50] sm:$0xff] }
  0x26   :  { %311 = vperm.xlu1 %1121, %v201_v20   ;;  %306 = vperm.xlu0 %1120, %v200_v21   ;;  %v775_v50 = vld [vmem:[%s1645_s3 + $0x68] sm:$0xff]  ;;  %v774_v51 = vld [vmem:[%s1645_s3 + $0x60] sm:$0xff]  ;;  %v777_v52 = vld [vmem:[%s1645_s3 + $0x78] sm:$0xff] }
  0x27   :  { %582 = vmatprep.mubr.f32.mxu1 %v119_v41  ;;  %v776_v53 = vld [vmem:[%s1645_s3 + $0x70] sm:$0xff]  ;;  %v779_v54 = vld [vmem:[%s1645_s3 + $0x88] sm:$0xff]  ;;  %v778_v55 = vld [vmem:[%s1645_s3 + $0x80] sm:$0xff] }
  0x28   :  { %v781_v56 = vld [vmem:[%s1645_s3 + $0x98] sm:$0xff]  ;;  %v780_v57 = vld [vmem:[%s1645_s3 + $0x90] sm:$0xff]  ;;  %v783_v58 = vld [vmem:[%s1645_s3 + $0xa8] sm:$0xff] }
  0x29   :  { %v782_v59 = vld [vmem:[%s1645_s3 + $0xa0] sm:$0xff]  ;;  %v785_v60 = vld [vmem:[%s1645_s3 + $0xb8] sm:$0xff]  ;;  %v784_v61 = vld [vmem:[%s1645_s3 + $0xb0] sm:$0xff] }
  0x2a   :  { %321 = vperm.xlu1 %1121, %v203_v22   ;;  %316 = vperm.xlu0 %1120, %v202_v23   ;;  %v787_v62 = vld [vmem:[%s1645_s3 + $0xc8] sm:$0xff]  ;;  %v786_v63 = vld [vmem:[%s1645_s3 + $0xc0] sm:$0xff]  ;;  %v789_v0 = vld [vmem:[%s1645_s3 + $0xd8] sm:$0xff] }
  0x2b   :  { %v788_v1 = vld [vmem:[%s1645_s3 + $0xd0] sm:$0xff]  ;;  %v791_v2 = vld [vmem:[%s1645_s3 + $0xe8] sm:$0xff]  ;;  %v790_v3 = vld [vmem:[%s1645_s3 + $0xe0] sm:$0xff] }
  0x2c   :  { %v793_v4 = vld [vmem:[%s1645_s3 + $0xf8] sm:$0xff]  ;;  %v792_v5 = vld [vmem:[%s1645_s3 + $0xf0] sm:$0xff]  ;;  %v150_v9 = vld [vmem:[%s1643_s1] sm:$0xff] }
  0x2d   :  { %v151_v10 = vld [vmem:[%s1643_s1 + $0x8] sm:$0xff]  ;;  %v152_v11 = vld [vmem:[%s1643_s1 + $0x10] sm:$0xff]  ;;  %v153_v13 = vld [vmem:[%s1643_s1 + $0x18] sm:$0xff] }
  0x2e   :  { %331 = vperm.xlu1 %1121, %v205_v24   ;;  %326 = vperm.xlu0 %1120, %v204_v25   ;;  %v155_v21 = vld [vmem:[%s1643_s1 + $0x28] sm:$0xff]  ;;  %v154_v23 = vld [vmem:[%s1643_s1 + $0x20] sm:$0xff] }
  0x32   :  { %341 = vperm.xlu1 %1121, %v207_v26   ;;  %336 = vperm.xlu0 %1120, %v206_v27  }
  0x36   :  { %351 = vperm.xlu1 %1121, %v209_v28   ;;  %346 = vperm.xlu0 %1120, %v208_v29   ;;  %v157_v28 = vld [vmem:[%s1643_s1 + $0x38] sm:$0xff] }
  0x3a   :  { %361 = vperm.xlu1 %1121, %v211_v30   ;;  %356 = vperm.xlu0 %1120, %v210_v31   ;;  %v156_v30 = vld [vmem:[%s1643_s1 + $0x30] sm:$0xff] }
  0x3e   :  { %371 = vperm.xlu1 %1121, %v213_v32   ;;  %366 = vperm.xlu0 %1120, %v212_v33  }
  0x42   :  { %801 = vperm.xlu1 %1121, %v763_v34   ;;  %796 = vperm.xlu0 %1120, %v762_v35   ;;  %v159_v35 = vld [vmem:[%s1643_s1 + $0x48] sm:$0xff] }
  0x46   :  { %811 = vperm.xlu1 %1121, %v765_v36   ;;  %806 = vperm.xlu0 %1120, %v764_v37   ;;  %v158_v37 = vld [vmem:[%s1643_s1 + $0x40] sm:$0xff] }
  0x4a   :  { %821 = vperm.xlu1 %1121, %v767_v42   ;;  %816 = vperm.xlu0 %1120, %v766_v43  }
  0x4e   :  { %831 = vperm.xlu1 %1121, %v769_v44   ;;  %826 = vperm.xlu0 %1120, %v768_v45   ;;  %v161_v44 = vld [vmem:[%s1643_s1 + $0x58] sm:$0xff] }
  0x52   :  { %841 = vperm.xlu1 %1121, %v771_v46   ;;  %836 = vperm.xlu0 %1120, %v770_v47   ;;  %v160_v46 = vld [vmem:[%s1643_s1 + $0x50] sm:$0xff] }
  0x56   :  { %851 = vperm.xlu1 %1121, %v773_v48   ;;  %846 = vperm.xlu0 %1120, %v772_v49  }
  0x5a   :  { %861 = vperm.xlu1 %1121, %v775_v50   ;;  %856 = vperm.xlu0 %1120, %v774_v51   ;;  %v163_v51 = vld [vmem:[%s1643_s1 + $0x68] sm:$0xff] }
  0x5e   :  { %871 = vperm.xlu1 %1121, %v777_v52   ;;  %866 = vperm.xlu0 %1120, %v776_v53   ;;  %v162_v53 = vld [vmem:[%s1643_s1 + $0x60] sm:$0xff] }
  0x62   :  { %881 = vperm.xlu1 %1121, %v779_v54   ;;  %876 = vperm.xlu0 %1120, %v778_v55  }
  0x66   :  { %891 = vperm.xlu1 %1121, %v781_v56   ;;  %886 = vperm.xlu0 %1120, %v780_v57  }
  0x6a   :  { %901 = vperm.xlu1 %1121, %v783_v58   ;;  %896 = vperm.xlu0 %1120, %v782_v59   ;;  %v165_v58 = vld [vmem:[%s1643_s1 + $0x78] sm:$0xff] }
  0x6e   :  { %911 = vperm.xlu1 %1121, %v785_v60   ;;  %906 = vperm.xlu0 %1120, %v784_v61   ;;  %v164_v60 = vld [vmem:[%s1643_s1 + $0x70] sm:$0xff] }
  0x72   :  { %921 = vperm.xlu1 %1121, %v787_v62   ;;  %916 = vperm.xlu0 %1120, %v786_v63  }
  0x76   :  { %931 = vperm.xlu1 %1121, %v789_v0   ;;  %926 = vperm.xlu0 %1120, %v788_v1   ;;  %v167_v1 = vld [vmem:[%s1643_s1 + $0x88] sm:$0xff] }
  0x7a   :  { %941 = vperm.xlu1 %1121, %v791_v2   ;;  %936 = vperm.xlu0 %1120, %v790_v3   ;;  %v166_v3 = vld [vmem:[%s1643_s1 + $0x80] sm:$0xff] }
  0x7e   :  { %951 = vperm.xlu1 %1121, %v793_v4   ;;  %946 = vperm.xlu0 %1120, %v792_v5  }
  0x81   :  { %v227_v6 = vpop.permute.xlu1 %226  ;;  %v217_v8 = vpop.permute.xlu0 %216 }
  0x82   :  { %v374_v15 = vmul.f32 %v217_v8, %v150_v9  ;;  %v376_v17 = vmul.f32 %v227_v6, %v152_v11  ;;  %v169_v9 = vld [vmem:[%s1643_s1 + $0x98] sm:$0xff]  ;;  %v168_v11 = vld [vmem:[%s1643_s1 + $0x90] sm:$0xff] }
  0x85   :  { %v232_v12 = vpop.permute.xlu1 %231  ;;  %v222_v14 = vpop.permute.xlu0 %221 }
  0x86   :  { %v375_v16 = vmul.f32 %v222_v14, %v151_v10  ;;  %v377_v18 = vmul.f32 %v232_v12, %v153_v13 }
  0x88   :  { %v1035_v19 = vpack.c.bf16 %v375_v16, %v374_v15  ;;  %v1038_v24 = vpack.c.bf16 %v377_v18, %v376_v17  ;;  %v171_v16 = vld [vmem:[%s1643_s1 + $0xa8] sm:$0xff]  ;;  %v170_v18 = vld [vmem:[%s1643_s1 + $0xa0] sm:$0xff] }
  0x89   :  { %v242_v20 = vpop.permute.xlu1 %241  ;;  %v237_v22 = vpop.permute.xlu0 %236 }
  0x8a   :  { %1036 = vmatpush1.bf16.msra.mxu0 %v1035_v19  ;;  %1098 = vmatpush1.bf16.msra.mxu1 %v1035_v19  ;;  %v379_v25 = vmul.f32 %v242_v20, %v155_v21  ;;  %v378_v26 = vmul.f32 %v237_v22, %v154_v23  ;;  %v173_v23 = vld [vmem:[%s1643_s1 + $0xb8] sm:$0xff] }
  0x8b   :  { %1037 = vmatprep.subr.bf16.mxu0 %v1147_v7  ;;  %1083 = vmatprep.subr.bf16.mxu1 %v1147_v7 }
  0x8c   :  { %v1041_v31 = vpack.c.bf16 %v379_v25, %v378_v26  ;;  %v172_v25 = vld [vmem:[%s1643_s1 + $0xb0] sm:$0xff] }
  0x8d   :  { %v252_v27 = vpop.permute.xlu1 %251  ;;  %v247_v29 = vpop.permute.xlu0 %246 }
  0x8e   :  { %1039 = vmatpush1.bf16.msra.mxu0 %v1038_v24  ;;  %1099 = vmatpush1.bf16.msra.mxu1 %v1038_v24  ;;  %v381_v32 = vmul.f32 %v252_v27, %v157_v28  ;;  %v380_v33 = vmul.f32 %v247_v29, %v156_v30  ;;  %v175_v30 = vld [vmem:[%s1643_s1 + $0xc8] sm:$0xff] }
  0x8f   :  { %1040 = vmatprep.subr.bf16.mxu0 %v1147_v7  ;;  %1084 = vmatprep.subr.bf16.mxu1 %v1147_v7 }
  0x90   :  { %v1044_v40 = vpack.c.bf16 %v381_v32, %v380_v33  ;;  %v174_v32 = vld [vmem:[%s1643_s1 + $0xc0] sm:$0xff] }
  0x91   :  { %v262_v34 = vpop.permute.xlu1 %261  ;;  %v257_v36 = vpop.permute.xlu0 %256 }
  0x92   :  { %1042 = vmatpush1.bf16.msra.mxu0 %v1041_v31  ;;  %1100 = vmatpush1.bf16.msra.mxu1 %v1041_v31  ;;  %v383_v41 = vmul.f32 %v262_v34, %v159_v35  ;;  %v382_v42 = vmul.f32 %v257_v36, %v158_v37  ;;  %v177_v37 = vld [vmem:[%s1643_s1 + $0xd8] sm:$0xff] }
  0x93   :  { %1043 = vmatprep.subr.bf16.mxu0 %v1147_v7  ;;  %1085 = vmatprep.subr.bf16.mxu1 %v1147_v7 }
  0x94   :  { %v1047_v47 = vpack.c.bf16 %v383_v41, %v382_v42  ;;  %v176_v41 = vld [vmem:[%s1643_s1 + $0xd0] sm:$0xff] }
  0x95   :  { %v272_v43 = vpop.permute.xlu1 %271  ;;  %v267_v45 = vpop.permute.xlu0 %266 }
  0x96   :  { %1045 = vmatpush1.bf16.msra.mxu0 %v1044_v40  ;;  %1101 = vmatpush1.bf16.msra.mxu1 %v1044_v40  ;;  %v385_v48 = vmul.f32 %v272_v43, %v161_v44  ;;  %v384_v49 = vmul.f32 %v267_v45, %v160_v46  ;;  %v179_v46 = vld [vmem:[%s1643_s1 + $0xe8] sm:$0xff] }
  0x97   :  { %1046 = vmatprep.subr.bf16.mxu0 %v1147_v7  ;;  %1086 = vmatprep.subr.bf16.mxu1 %v1147_v7 }
  0x98   :  { %v1050_v54 = vpack.c.bf16 %v385_v48, %v384_v49  ;;  %v178_v48 = vld [vmem:[%s1643_s1 + $0xe0] sm:$0xff] }
  0x99   :  { %v282_v50 = vpop.permute.xlu1 %281  ;;  %v277_v52 = vpop.permute.xlu0 %276 }
  0x9a   :  { %1048 = vmatpush1.bf16.msra.mxu0 %v1047_v47  ;;  %1102 = vmatpush1.bf16.msra.mxu1 %v1047_v47  ;;  %v387_v55 = vmul.f32 %v282_v50, %v163_v51  ;;  %v386_v56 = vmul.f32 %v277_v52, %v162_v53  ;;  %v181_v53 = vld [vmem:[%s1643_s1 + $0xf8] sm:$0xff] }
  0x9b   :  { %1049 = vmatprep.subr.bf16.mxu0 %v1147_v7  ;;  %1087 = vmatprep.subr.bf16.mxu1 %v1147_v7 }
  0x9c   :  { %v1053_v61 = vpack.c.bf16 %v387_v55, %v386_v56  ;;  %v180_v55 = vld [vmem:[%s1643_s1 + $0xf0] sm:$0xff] }
  0x9d   :  { %v292_v57 = vpop.permute.xlu1 %291  ;;  %v287_v59 = vpop.permute.xlu0 %286 }
  0x9e   :  { %1051 = vmatpush1.bf16.msra.mxu0 %v1050_v54  ;;  %1103 = vmatpush1.bf16.msra.mxu1 %v1050_v54  ;;  %v389_v62 = vmul.f32 %v292_v57, %v165_v58  ;;  %v388_v63 = vmul.f32 %v287_v59, %v164_v60  ;;  %v55_v59 = vld [vmem:[%s1642_s0 + $0x8] sm:$0xff] }
  0x9f   :  { %1052 = vmatprep.subr.bf16.mxu0 %v1147_v7  ;;  %1088 = vmatprep.subr.bf16.mxu1 %v1147_v7  ;;  %v71_v60 = vld [vmem:[%s1642_s0 + $0x88] sm:$0xff] }
  0xa0   :  { %v1056_v4 = vpack.c.bf16 %v389_v62, %v388_v63  ;;  %v86_v62 = vunpack.c.l.bf16 %v1289_v38  ;;  %v118_v63 = vunpack.c.l.bf16 %v1294_v39 }
  0xa1   :  { %v302_v0 = vpop.permute.xlu1 %301  ;;  %v297_v2 = vpop.permute.xlu0 %296 }
  0xa2   :  { %1054 = vmatpush1.bf16.msra.mxu0 %v1053_v61  ;;  %1104 = vmatpush1.bf16.msra.mxu1 %v1053_v61  ;;  %v391_v5 = vmul.f32 %v302_v0, %v167_v1  ;;  %v390_v6 = vmul.f32 %v297_v2, %v166_v3  ;;  %v89_v0 = vunpack.c.h.bf16 %v55_v59  ;;  %v121_v1 = vunpack.c.h.bf16 %v71_v60  ;;  %v72_v2 = vld [vmem:[%s1642_s0 + $0x90] sm:$0xff] }
  0xa3   :  { %1055 = vmatprep.subr.bf16.mxu0 %v1147_v7  ;;  %1089 = vmatprep.subr.bf16.mxu1 %v1147_v7  ;;  %v88_v3 = vunpack.c.l.bf16 %v55_v59  ;;  %v123_v39 = vunpack.c.h.bf16 %v72_v2 }
  0xa4   :  { %v1059_v12 = vpack.c.bf16 %v391_v5, %v390_v6  ;;  %v57_v5 = vld [vmem:[%s1642_s0 + $0x18] sm:$0xff] }
  0xa5   :  { %v312_v8 = vpop.permute.xlu1 %311  ;;  %v307_v10 = vpop.permute.xlu0 %306  ;;  %v73_v6 = vld [vmem:[%s1642_s0 + $0x98] sm:$0xff] }
  0xa6   :  { %1057 = vmatpush1.bf16.msra.mxu0 %v1056_v4  ;;  %1105 = vmatpush1.bf16.msra.mxu1 %v1056_v4  ;;  %v393_v13 = vmul.f32 %v312_v8, %v169_v9  ;;  %v392_v14 = vmul.f32 %v307_v10, %v168_v11  ;;  %v120_v4 = vunpack.c.l.bf16 %v71_v60  ;;  %v122_v9 = vunpack.c.l.bf16 %v72_v2 }
  0xa7   :  { %1058 = vmatprep.subr.bf16.mxu0 %v1147_v7  ;;  %1090 = vmatprep.subr.bf16.mxu1 %v1147_v7  ;;  %v93_v10 = vunpack.c.h.bf16 %v57_v5  ;;  %v125_v11 = vunpack.c.h.bf16 %v73_v6 }
  0xa8   :  { %v1062_v19 = vpack.c.bf16 %v393_v13, %v392_v14  ;;  %v74_v13 = vld [vmem:[%s1642_s0 + $0xa0] sm:$0xff]  ;;  %v92_v14 = vunpack.c.l.bf16 %v57_v5 }
  0xa9   :  { %v322_v15 = vpop.permute.xlu1 %321  ;;  %v317_v17 = vpop.permute.xlu0 %316 }
  0xaa   :  { %1060 = vmatpush1.bf16.msra.mxu0 %v1059_v12  ;;  %1106 = vmatpush1.bf16.msra.mxu1 %v1059_v12  ;;  %v395_v20 = vmul.f32 %v322_v15, %v171_v16  ;;  %v394_v21 = vmul.f32 %v317_v17, %v170_v18  ;;  %v58_v12 = vld [vmem:[%s1642_s0 + $0x20] sm:$0xff]  ;;  %v124_v15 = vunpack.c.l.bf16 %v73_v6  ;;  %v127_v17 = vunpack.c.h.bf16 %v74_v13  ;;  %v59_v18 = vld [vmem:[%s1642_s0 + $0x28] sm:$0xff] }
  0xab   :  { %1061 = vmatprep.subr.bf16.mxu0 %v1147_v7  ;;  %1091 = vmatprep.subr.bf16.mxu1 %v1147_v7  ;;  %v95_v16 = vunpack.c.h.bf16 %v58_v12 }
  0xac   :  { %v1065_v26 = vpack.c.bf16 %v395_v20, %v394_v21  ;;  %v94_v20 = vunpack.c.l.bf16 %v58_v12  ;;  %v126_v21 = vunpack.c.l.bf16 %v74_v13 }
  0xad   :  { %v332_v22 = vpop.permute.xlu1 %331  ;;  %v327_v24 = vpop.permute.xlu0 %326 }
  0xae   :  { %1063 = vmatpush1.bf16.msra.mxu0 %v1062_v19  ;;  %1107 = vmatpush1.bf16.msra.mxu1 %v1062_v19  ;;  %v397_v27 = vmul.f32 %v332_v22, %v173_v23  ;;  %v396_v28 = vmul.f32 %v327_v24, %v172_v25  ;;  %v75_v19 = vld [vmem:[%s1642_s0 + $0xa8] sm:$0xff]  ;;  %v97_v22 = vunpack.c.h.bf16 %v59_v18  ;;  %v60_v24 = vld [vmem:[%s1642_s0 + $0x30] sm:$0xff] }
  0xaf   :  { %1064 = vmatprep.subr.bf16.mxu0 %v1147_v7  ;;  %1092 = vmatprep.subr.bf16.mxu1 %v1147_v7  ;;  %v129_v23 = vunpack.c.h.bf16 %v75_v19  ;;  %v76_v25 = vld [vmem:[%s1642_s0 + $0xb0] sm:$0xff] }
  0xb0   :  { %v1068_v33 = vpack.c.bf16 %v397_v27, %v396_v28  ;;  %v128_v27 = vunpack.c.l.bf16 %v75_v19  ;;  %v99_v28 = vunpack.c.h.bf16 %v60_v24 }
  0xb1   :  { %v342_v29 = vpop.permute.xlu1 %341  ;;  %v337_v31 = vpop.permute.xlu0 %336 }
  0xb2   :  { %1066 = vmatpush1.bf16.msra.mxu0 %v1065_v26  ;;  %1108 = vmatpush1.bf16.msra.mxu1 %v1065_v26  ;;  %v399_v34 = vmul.f32 %v342_v29, %v175_v30  ;;  %v398_v35 = vmul.f32 %v337_v31, %v174_v32  ;;  %v96_v26 = vunpack.c.l.bf16 %v59_v18  ;;  %v131_v29 = vunpack.c.h.bf16 %v76_v25  ;;  %v61_v30 = vld [vmem:[%s1642_s0 + $0x38] sm:$0xff] }
  0xb3   :  { %1067 = vmatprep.subr.bf16.mxu0 %v1147_v7  ;;  %1093 = vmatprep.subr.bf16.mxu1 %v1147_v7  ;;  %v77_v31 = vld [vmem:[%s1642_s0 + $0xb8] sm:$0xff]  ;;  %v98_v32 = vunpack.c.l.bf16 %v60_v24 }
  0xb4   :  { %v1071_v42 = vpack.c.bf16 %v399_v34, %v398_v35  ;;  %v101_v34 = vunpack.c.h.bf16 %v61_v30  ;;  %v133_v35 = vunpack.c.h.bf16 %v77_v31 }
  0xb5   :  { %v352_v36 = vpop.permute.xlu1 %351  ;;  %v347_v40 = vpop.permute.xlu0 %346 }
  0xb6   :  { %1069 = vmatpush1.bf16.msra.mxu0 %v1068_v33  ;;  %1109 = vmatpush1.bf16.msra.mxu1 %v1068_v33  ;;  %v401_v43 = vmul.f32 %v352_v36, %v177_v37  ;;  %v400_v44 = vmul.f32 %v347_v40, %v176_v41  ;;  %v130_v33 = vunpack.c.l.bf16 %v76_v25  ;;  %v62_v36 = vld [vmem:[%s1642_s0 + $0x40] sm:$0xff]  ;;  %v100_v40 = vunpack.c.l.bf16 %v61_v30 }
  0xb7   :  { %1070 = vmatprep.subr.bf16.mxu0 %v1147_v7  ;;  %1094 = vmatprep.subr.bf16.mxu1 %v1147_v7  ;;  %v78_v37 = vld [vmem:[%s1642_s0 + $0xc0] sm:$0xff]  ;;  %v132_v41 = vunpack.c.l.bf16 %v77_v31 }
  0xb8   :  { %v1074_v49 = vpack.c.bf16 %v401_v43, %v400_v44  ;;  %v135_v43 = vunpack.c.h.bf16 %v78_v37  ;;  %v63_v44 = vld [vmem:[%s1642_s0 + $0x48] sm:$0xff] }
  0xb9   :  { %v362_v45 = vpop.permute.xlu1 %361  ;;  %v357_v47 = vpop.permute.xlu0 %356 }
  0xba   :  { %1072 = vmatpush1.bf16.msra.mxu0 %v1071_v42  ;;  %1110 = vmatpush1.bf16.msra.mxu1 %v1071_v42  ;;  %v403_v50 = vmul.f32 %v362_v45, %v179_v46  ;;  %v402_v51 = vmul.f32 %v357_v47, %v178_v48  ;;  %v103_v42 = vunpack.c.h.bf16 %v62_v36  ;;  %v79_v45 = vld [vmem:[%s1642_s0 + $0xc8] sm:$0xff]  ;;  %v102_v46 = vunpack.c.l.bf16 %v62_v36 }
  0xbb   :  { %1073 = vmatprep.subr.bf16.mxu0 %v1147_v7  ;;  %1095 = vmatprep.subr.bf16.mxu1 %v1147_v7  ;;  %v134_v47 = vunpack.c.l.bf16 %v78_v37  ;;  %v105_v48 = vunpack.c.h.bf16 %v63_v44 }
  0xbc   :  { %v1077_v56 = vpack.c.bf16 %v403_v50, %v402_v51  ;;  %v64_v50 = vld [vmem:[%s1642_s0 + $0x50] sm:$0xff] }
  0xbd   :  { %v372_v52 = vpop.permute.xlu1 %371  ;;  %v367_v54 = vpop.permute.xlu0 %366  ;;  %v80_v51 = vld [vmem:[%s1642_s0 + $0xd0] sm:$0xff] }
  0xbe   :  { %1075 = vmatpush1.bf16.msra.mxu0 %v1074_v49  ;;  %1111 = vmatpush1.bf16.msra.mxu1 %v1074_v49  ;;  %v405_v57 = vmul.f32 %v372_v52, %v181_v53  ;;  %v404_v58 = vmul.f32 %v367_v54, %v180_v55  ;;  %v137_v49 = vunpack.c.h.bf16 %v79_v45  ;;  %v104_v52 = vunpack.c.l.bf16 %v63_v44 }
  0xbf   :  { %1076 = vmatprep.subr.bf16.mxu0 %v1147_v7  ;;  %1096 = vmatprep.subr.bf16.mxu1 %v1147_v7  ;;  %v136_v53 = vunpack.c.l.bf16 %v79_v45  ;;  %v107_v54 = vunpack.c.h.bf16 %v64_v50  ;;  %v139_v55 = vunpack.c.h.bf16 %v80_v51  ;;  %v138_v59 = vunpack.c.l.bf16 %v80_v51 }
  0xc0   :  { %v1080_v61 = vpack.c.bf16 %v405_v57, %v404_v58  ;;  %v81_v57 = vld [vmem:[%s1642_s0 + $0xd8] sm:$0xff]  ;;  %v106_v58 = vunpack.c.l.bf16 %v64_v50 }
  0xc2   :  { %1078 = vmatpush1.bf16.msra.mxu0 %v1077_v56  ;;  %1112 = vmatpush1.bf16.msra.mxu1 %v1077_v56  ;;  %v65_v56 = vld [vmem:[%s1642_s0 + $0x58] sm:$0xff] }
  0xc3   :  { %1079 = vmatprep.subr.bf16.mxu0 %v1147_v7  ;;  %1097 = vmatprep.subr.bf16.mxu1 %v1147_v7  ;;  %v56_v7 = vld [vmem:[%s1642_s0 + $0x10] sm:$0xff]  ;;  %v109_v60 = vunpack.c.h.bf16 %v65_v56 }
  0xc4   :  { %v91_v38 = vunpack.c.h.bf16 %v56_v7  ;;  %v90_v8 = vunpack.c.l.bf16 %v56_v7 }
  0xc6   :  { %1081 = vmatpush1.bf16.msra.mxu0 %v1080_v61  ;;  %1113 = vmatpush1.bf16.msra.mxu1 %v1080_v61  ;;  %v141_v61 = vunpack.c.h.bf16 %v81_v57 }
  0xc9   :  { %503 = vmatmul.mubr.f32.vlgmr.msra.gmra.mrb[0].mxu0 %v86_v62  ;;  %583 = vmatmul.mubr.f32.vlgmr.msra.gmra.mrb[0].mxu1 %v118_v63  ;;  %v66_v62 = vld [vmem:[%s1642_s0 + $0x60] sm:$0xff] }
  0xca   :  { %507 = vmatprep.mubr.f32.mxu0 %v89_v0  ;;  %587 = vmatprep.mubr.f32.mxu1 %v121_v1  ;;  %v82_v63 = vld [vmem:[%s1642_s0 + $0xe0] sm:$0xff]  ;;  %v108_v0 = vunpack.c.l.bf16 %v65_v56  ;;  %v140_v1 = vunpack.c.l.bf16 %v81_v57  ;;  %v111_v7 = vunpack.c.h.bf16 %v66_v62 }
  0xcb   :  { %v143_v2 = vunpack.c.h.bf16 %v82_v63 }
  0xcd   :  { %508 = vmatmul.mubr.f32.gmra.mrb[2].mxu0 %v88_v3  ;;  %588 = vmatmul.mubr.f32.gmra.mrb[2].mxu1 %v120_v4  ;;  %v67_v3 = vld [vmem:[%s1642_s0 + $0x68] sm:$0xff] }
  0xce   :  { %512 = vmatprep.mubr.f32.mxu0 %v91_v38  ;;  %592 = vmatprep.mubr.f32.mxu1 %v123_v39  ;;  %v83_v4 = vld [vmem:[%s1642_s0 + $0xe8] sm:$0xff]  ;;  %v110_v38 = vunpack.c.l.bf16 %v66_v62  ;;  %v142_v39 = vunpack.c.l.bf16 %v82_v63  ;;  %v113_v5 = vunpack.c.h.bf16 %v67_v3 }
  0xcf   :  { %v145_v6 = vunpack.c.h.bf16 %v83_v4 }
  0xd1   :  { %513 = vmatmul.mubr.f32.gmra.mrb[4].mxu0 %v90_v8  ;;  %593 = vmatmul.mubr.f32.gmra.mrb[4].mxu1 %v122_v9  ;;  %v68_v8 = vld [vmem:[%s1642_s0 + $0x70] sm:$0xff] }
  0xd2   :  { %517 = vmatprep.mubr.f32.mxu0 %v93_v10  ;;  %597 = vmatprep.mubr.f32.mxu1 %v125_v11  ;;  %v84_v9 = vld [vmem:[%s1642_s0 + $0xf0] sm:$0xff]  ;;  %v112_v10 = vunpack.c.l.bf16 %v67_v3  ;;  %v144_v11 = vunpack.c.l.bf16 %v83_v4  ;;  %v115_v12 = vunpack.c.h.bf16 %v68_v8 }
  0xd3   :  { %v147_v13 = vunpack.c.h.bf16 %v84_v9 }
  0xd5   :  { %518 = vmatmul.mubr.f32.gmra.mrb[6].mxu0 %v92_v14  ;;  %598 = vmatmul.mubr.f32.gmra.mrb[6].mxu1 %v124_v15  ;;  %v69_v14 = vld [vmem:[%s1642_s0 + $0x78] sm:$0xff] }
  0xd6   :  { %522 = vmatprep.mubr.f32.mxu0 %v95_v16  ;;  %602 = vmatprep.mubr.f32.mxu1 %v127_v17  ;;  %v85_v15 = vld [vmem:[%s1642_s0 + $0xf8] sm:$0xff]  ;;  %v114_v16 = vunpack.c.l.bf16 %v68_v8  ;;  %v146_v17 = vunpack.c.l.bf16 %v84_v9  ;;  %v117_v18 = vunpack.c.h.bf16 %v69_v14  ;;  %s1148_s0 = smov [#allocation2]  }
  0xd7   :  { %v149_v19 = vunpack.c.h.bf16 %v85_v15  ;;  %s1023_s1 = sshll.u32 %s1148_s0, 4  ;;  %s1024_s1 = int_to_ptr.vmem [resolvable:$true] %s1023_s1 }
  0xd8   :  { %s1122_s23 = scalar_lea.vmem %s1024_s1, 4096  ;;  %p1127_p1 = scmp.lt.s32.totalorder %s1024_s1, %s1024_s1 }
  0xd9   :  { %523 = vmatmul.mubr.f32.gmra.mrb[8].mxu0 %v94_v20  ;;  %603 = vmatmul.mubr.f32.gmra.mrb[8].mxu1 %v126_v21  ;;  %v116_v20 = vunpack.c.l.bf16 %v69_v14  ;;  %v148_v21 = vunpack.c.l.bf16 %v85_v15  ;;  %p1123_p0 = scmp.ne.s32.totalorder %s1024_s1, %s1122_s23  ;;  %p1128_p2 = scmp.lt.s32.totalorder %s1122_s23, %s1122_s23 }
  0xda   :  { %527 = vmatprep.mubr.f32.mxu0 %v97_v22  ;;  %607 = vmatprep.mubr.f32.mxu1 %v129_v23  ;;  %v797_v22 = vpop.permute.xlu0 %796  ;;  %v802_v23 = vpop.permute.xlu1 %801 }
  0xdb   :  { %p1129_p3 = por %p1128_p2, %p1127_p1 }
  0xdd   :  { %528 = vmatmul.mubr.f32.gmra.mrb[10].mxu0 %v96_v26  ;;  %608 = vmatmul.mubr.f32.gmra.mrb[10].mxu1 %v128_v27  ;;  %p1130_p4 = pnand %p1129_p3, %p1123_p0 }
  0xde   :  { %532 = vmatprep.mubr.f32.mxu0 %v99_v28  ;;  %612 = vmatprep.mubr.f32.mxu1 %v131_v29  ;;  %v807_v24 = vpop.permute.xlu0 %806  ;;  %v812_v25 = vpop.permute.xlu1 %811 }
  0xe1   :  { %533 = vmatmul.mubr.f32.gmra.mrb[12].mxu0 %v98_v32  ;;  %613 = vmatmul.mubr.f32.gmra.mrb[12].mxu1 %v130_v33 }
  0xe2   :  { %537 = vmatprep.mubr.f32.mxu0 %v101_v34  ;;  %617 = vmatprep.mubr.f32.mxu1 %v133_v35  ;;  %v817_v26 = vpop.permute.xlu0 %816  ;;  %v822_v27 = vpop.permute.xlu1 %821 }
  0xe5   :  { %538 = vmatmul.mubr.f32.gmra.mrb[14].mxu0 %v100_v40  ;;  %618 = vmatmul.mubr.f32.gmra.mrb[14].mxu1 %v132_v41 }
  0xe6   :  { %542 = vmatprep.mubr.f32.mxu0 %v103_v42  ;;  %622 = vmatprep.mubr.f32.mxu1 %v135_v43  ;;  %v1600_v28 = vpop.permute.xlu0 %826  ;;  %v1602_v29 = vpop.permute.xlu1 %831 }
  0xe9   :  { %543 = vmatmul.mubr.f32.gmra.mrb[16].mxu0 %v102_v46  ;;  %623 = vmatmul.mubr.f32.gmra.mrb[16].mxu1 %v134_v47 }
  0xea   :  { %547 = vmatprep.mubr.f32.mxu0 %v105_v48  ;;  %627 = vmatprep.mubr.f32.mxu1 %v137_v49  ;;  %v1604_v30 = vpop.permute.xlu0 %836  ;;  %v1606_v31 = vpop.permute.xlu1 %841 }
  0xed   :  { %548 = vmatmul.mubr.f32.gmra.mrb[18].mxu0 %v104_v52  ;;  %628 = vmatmul.mubr.f32.gmra.mrb[18].mxu1 %v136_v53 }
  0xee   :  { %552 = vmatprep.mubr.f32.mxu0 %v107_v54  ;;  %632 = vmatprep.mubr.f32.mxu1 %v139_v55  ;;  %v1608_v32 = vpop.permute.xlu0 %846  ;;  %v1610_v33 = vpop.permute.xlu1 %851 }
  0xf1   :  { %553 = vmatmul.mubr.f32.gmra.mrb[20].mxu0 %v106_v58  ;;  %633 = vmatmul.mubr.f32.gmra.mrb[20].mxu1 %v138_v59 }
  0xf2   :  { %557 = vmatprep.mubr.f32.mxu0 %v109_v60  ;;  %637 = vmatprep.mubr.f32.mxu1 %v141_v61  ;;  %v1612_v34 = vpop.permute.xlu0 %856  ;;  %v1614_v35 = vpop.permute.xlu1 %861 }
  0xf5   :  { %558 = vmatmul.mubr.f32.gmra.mrb[22].mxu0 %v108_v0  ;;  %638 = vmatmul.mubr.f32.gmra.mrb[22].mxu1 %v140_v1 }
  0xf6   :  { %562 = vmatprep.mubr.f32.mxu0 %v111_v7  ;;  %642 = vmatprep.mubr.f32.mxu1 %v143_v2  ;;  %v1616_v36 = vpop.permute.xlu0 %866  ;;  %v1618_v37 = vpop.permute.xlu1 %871 }
  0xf9   :  { %563 = vmatmul.mubr.f32.gmra.mrb[24].mxu0 %v110_v38  ;;  %643 = vmatmul.mubr.f32.gmra.mrb[24].mxu1 %v142_v39 }
  0xfa   :  { %567 = vmatprep.mubr.f32.mxu0 %v113_v5  ;;  %647 = vmatprep.mubr.f32.mxu1 %v145_v6  ;;  %v877_v44 = vpop.permute.xlu0 %876  ;;  %v882_v51 = vpop.permute.xlu1 %881 }
  0xfd   :  { %568 = vmatmul.mubr.f32.gmra.mrb[26].mxu0 %v112_v10  ;;  %648 = vmatmul.mubr.f32.gmra.mrb[26].mxu1 %v144_v11 }
  0xfe   :  { %572 = vmatprep.mubr.f32.mxu0 %v115_v12  ;;  %652 = vmatprep.mubr.f32.mxu1 %v147_v13  ;;  %v887_v58 = vpop.permute.xlu0 %886  ;;  %v892_v1 = vpop.permute.xlu1 %891 }
 0x101   :  { %573 = vmatmul.mubr.f32.gmra.mrb[28].mxu0 %v114_v16  ;;  %653 = vmatmul.mubr.f32.gmra.mrb[28].mxu1 %v146_v17 }
 0x102   :  { %577 = vmatprep.mubr.f32.mxu0 %v117_v18  ;;  %657 = vmatprep.mubr.f32.mxu1 %v149_v19  ;;  %v897_v5 = vpop.permute.xlu0 %896  ;;  %v902_v13 = vpop.permute.xlu1 %901 }
 0x105   :  { %578 = vmatmul.mubr.f32.gmra.mrb[30].mxu0 %v116_v20  ;;  %658 = vmatmul.mubr.f32.gmra.mrb[30].mxu1 %v148_v21 }
 0x106   :  { %v907_v20 = vpop.permute.xlu0 %906 }
 0x19c   :  { %v504_v40 = vpop.f32.mrb[0].mxu0  ;;  %v584_v41 = vpop.f32.mrb[0].mxu1 }
 0x19d   :  { %v506_v42 = vpop.f32.mrb[1].mxu0  ;;  %v586_v43 = vpop.f32.mrb[1].mxu1  ;;  %v954_v45 = vmul.f32 %v797_v22, %v504_v40  ;;  %v970_v46 = vmul.f32 %v877_v44, %v584_v41 }
 0x19e   :  { %v912_v40 = vpop.permute.xlu1 %911 }
 0x19f   :  { %986 = vst [vmem:[#allocation2] sm:$0xff] %v954_v45  ;;  %1002 = vst [vmem:[#allocation2 + $0x80] sm:$0xff] %v970_v46  ;;  %v917_v46 = vpop.permute.xlu0 %916 }
 0x1a0   :  { %v509_v47 = vpop.f32.mrb[2].mxu0  ;;  %v589_v48 = vpop.f32.mrb[2].mxu1 }
 0x1a1   :  { %v511_v49 = vpop.f32.mrb[3].mxu0  ;;  %v591_v50 = vpop.f32.mrb[3].mxu1  ;;  %v955_v52 = vmul.f32 %v802_v23, %v509_v47  ;;  %v971_v53 = vmul.f32 %v882_v51, %v589_v48 }
 0x1a3   :  { %987 = vst [vmem:[#allocation2 + $0x8] sm:$0xff] %v955_v52  ;;  %1003 = vst [vmem:[#allocation2 + $0x88] sm:$0xff] %v971_v53  ;;  %v922_v52 = vpop.permute.xlu1 %921 }
 0x1a4   :  { %v514_v54 = vpop.f32.mrb[4].mxu0  ;;  %v594_v55 = vpop.f32.mrb[4].mxu1 }
 0x1a5   :  { %v516_v56 = vpop.f32.mrb[5].mxu0  ;;  %v596_v57 = vpop.f32.mrb[5].mxu1  ;;  %v956_v59 = vmul.f32 %v807_v24, %v514_v54  ;;  %v972_v60 = vmul.f32 %v887_v58, %v594_v55 }
 0x1a6   :  { %v927_v58 = vpop.permute.xlu0 %926 }
 0x1a7   :  { %988 = vst [vmem:[#allocation2 + $0x10] sm:$0xff] %v956_v59  ;;  %1004 = vst [vmem:[#allocation2 + $0x90] sm:$0xff] %v972_v60 }
 0x1a8   :  { %v519_v61 = vpop.f32.mrb[6].mxu0  ;;  %v599_v62 = vpop.f32.mrb[6].mxu1 }
 0x1a9   :  { %v521_v63 = vpop.f32.mrb[7].mxu0  ;;  %v601_v0 = vpop.f32.mrb[7].mxu1  ;;  %v957_v7 = vmul.f32 %v812_v25, %v519_v61  ;;  %v973_v2 = vmul.f32 %v892_v1, %v599_v62 }
 0x1aa   :  { %v932_v0 = vpop.permute.xlu1 %931 }
 0x1ab   :  { %989 = vst [vmem:[#allocation2 + $0x18] sm:$0xff] %v957_v7  ;;  %1005 = vst [vmem:[#allocation2 + $0x98] sm:$0xff] %v973_v2 }
 0x1ac   :  { %v524_v3 = vpop.f32.mrb[8].mxu0  ;;  %v604_v4 = vpop.f32.mrb[8].mxu1 }
 0x1ad   :  { %v526_v38 = vpop.f32.mrb[9].mxu0  ;;  %v606_v39 = vpop.f32.mrb[9].mxu1  ;;  %v958_v6 = vmul.f32 %v817_v26, %v524_v3  ;;  %v974_v8 = vmul.f32 %v897_v5, %v604_v4 }
 0x1ae   :  { %v937_v38 = vpop.permute.xlu0 %936 }
 0x1af   :  { %990 = vst [vmem:[#allocation2 + $0x20] sm:$0xff] %v958_v6  ;;  %1006 = vst [vmem:[#allocation2 + $0xa0] sm:$0xff] %v974_v8 }
 0x1b0   :  { %v529_v9 = vpop.f32.mrb[10].mxu0  ;;  %v609_v10 = vpop.f32.mrb[10].mxu1 }
 0x1b1   :  { %v531_v11 = vpop.f32.mrb[11].mxu0  ;;  %v611_v12 = vpop.f32.mrb[11].mxu1  ;;  %v959_v14 = vmul.f32 %v822_v27, %v529_v9  ;;  %v975_v15 = vmul.f32 %v902_v13, %v609_v10 }
 0x1b2   :  { %v942_v10 = vpop.permute.xlu1 %941 }
 0x1b3   :  { %991 = vst [vmem:[#allocation2 + $0x28] sm:$0xff] %v959_v14  ;;  %1007 = vst [vmem:[#allocation2 + $0xa8] sm:$0xff] %v975_v15 }
 0x1b4   :  { %v534_v16 = vpop.f32.mrb[12].mxu0  ;;  %v614_v17 = vpop.f32.mrb[12].mxu1 }
 0x1b5   :  { %v536_v18 = vpop.f32.mrb[13].mxu0  ;;  %v616_v19 = vpop.f32.mrb[13].mxu1  ;;  %v960_v21 = vmul.f32 %v1600_v28, %v534_v16  ;;  %v976_v22 = vmul.f32 %v907_v20, %v614_v17 }
 0x1b6   :  { %v947_v16 = vpop.permute.xlu0 %946 }
 0x1b7   :  { %992 = vst [vmem:[#allocation2 + $0x30] sm:$0xff] %v960_v21  ;;  %1008 = vst [vmem:[#allocation2 + $0xb0] sm:$0xff] %v976_v22 }
 0x1b8   :  { %v539_v23 = vpop.f32.mrb[14].mxu0  ;;  %v619_v24 = vpop.f32.mrb[14].mxu1 }
 0x1b9   :  { %v541_v25 = vpop.f32.mrb[15].mxu0  ;;  %v621_v26 = vpop.f32.mrb[15].mxu1  ;;  %v961_v27 = vmul.f32 %v1602_v29, %v539_v23  ;;  %v977_v41 = vmul.f32 %v912_v40, %v619_v24 }
 0x1bb   :  { %993 = vst [vmem:[#allocation2 + $0x38] sm:$0xff] %v961_v27  ;;  %1009 = vst [vmem:[#allocation2 + $0xb8] sm:$0xff] %v977_v41 }
 0x1bc   :  { %v544_v42 = vpop.f32.mrb[16].mxu0  ;;  %v624_v43 = vpop.f32.mrb[16].mxu1 }
 0x1bd   :  { %v546_v44 = vpop.f32.mrb[17].mxu0  ;;  %v626_v45 = vpop.f32.mrb[17].mxu1  ;;  %v962_v28 = vmul.f32 %v1604_v30, %v544_v42  ;;  %v978_v47 = vmul.f32 %v917_v46, %v624_v43 }
 0x1bf   :  { %994 = vst [vmem:[#allocation2 + $0x40] sm:$0xff] %v962_v28  ;;  %1010 = vst [vmem:[#allocation2 + $0xc0] sm:$0xff] %v978_v47 }
 0x1c0   :  { %v549_v48 = vpop.f32.mrb[18].mxu0  ;;  %v629_v49 = vpop.f32.mrb[18].mxu1 }
 0x1c1   :  { %v551_v50 = vpop.f32.mrb[19].mxu0  ;;  %v631_v51 = vpop.f32.mrb[19].mxu1  ;;  %v963_v29 = vmul.f32 %v1606_v31, %v549_v48  ;;  %v979_v53 = vmul.f32 %v922_v52, %v629_v49 }
 0x1c3   :  { %995 = vst [vmem:[#allocation2 + $0x48] sm:$0xff] %v963_v29  ;;  %1011 = vst [vmem:[#allocation2 + $0xc8] sm:$0xff] %v979_v53 }
 0x1c4   :  { %v554_v54 = vpop.f32.mrb[20].mxu0  ;;  %v634_v55 = vpop.f32.mrb[20].mxu1 }
 0x1c5   :  { %v556_v56 = vpop.f32.mrb[21].mxu0  ;;  %v636_v57 = vpop.f32.mrb[21].mxu1  ;;  %v964_v30 = vmul.f32 %v1608_v32, %v554_v54  ;;  %v980_v59 = vmul.f32 %v927_v58, %v634_v55 }
 0x1c7   :  { %996 = vst [vmem:[#allocation2 + $0x50] sm:$0xff] %v964_v30  ;;  %1012 = vst [vmem:[#allocation2 + $0xd0] sm:$0xff] %v980_v59 }
 0x1c8   :  { %v559_v60 = vpop.f32.mrb[22].mxu0  ;;  %v639_v61 = vpop.f32.mrb[22].mxu1 }
 0x1c9   :  { %v561_v62 = vpop.f32.mrb[23].mxu0  ;;  %v641_v63 = vpop.f32.mrb[23].mxu1  ;;  %v965_v31 = vmul.f32 %v1610_v33, %v559_v60  ;;  %v981_v1 = vmul.f32 %v932_v0, %v639_v61 }
 0x1cb   :  { %997 = vst [vmem:[#allocation2 + $0x58] sm:$0xff] %v965_v31  ;;  %1013 = vst [vmem:[#allocation2 + $0xd8] sm:$0xff] %v981_v1 }
 0x1cc   :  { %v564_v7 = vpop.f32.mrb[24].mxu0  ;;  %v644_v2 = vpop.f32.mrb[24].mxu1 }
 0x1cd   :  { %v566_v3 = vpop.f32.mrb[25].mxu0  ;;  %v646_v4 = vpop.f32.mrb[25].mxu1  ;;  %v966_v32 = vmul.f32 %v1612_v34, %v564_v7  ;;  %v982_v39 = vmul.f32 %v937_v38, %v644_v2 }
 0x1cf   :  { %998 = vst [vmem:[#allocation2 + $0x60] sm:$0xff] %v966_v32  ;;  %1014 = vst [vmem:[#allocation2 + $0xe0] sm:$0xff] %v982_v39 }
 0x1d0   :  { %v569_v5 = vpop.f32.mrb[26].mxu0  ;;  %v649_v6 = vpop.f32.mrb[26].mxu1 }
 0x1d1   :  { %v571_v8 = vpop.f32.mrb[27].mxu0  ;;  %v651_v9 = vpop.f32.mrb[27].mxu1  ;;  %v967_v33 = vmul.f32 %v1614_v35, %v569_v5  ;;  %v983_v11 = vmul.f32 %v942_v10, %v649_v6 }
 0x1d2   :  { %v952_v35 = vpop.permute.xlu1 %951 }
 0x1d3   :  { %999 = vst [vmem:[#allocation2 + $0x68] sm:$0xff] %v967_v33  ;;  %1015 = vst [vmem:[#allocation2 + $0xe8] sm:$0xff] %v983_v11 }
 0x1d4   :  { %v574_v12 = vpop.f32.mrb[28].mxu0  ;;  %v654_v13 = vpop.f32.mrb[28].mxu1 }
 0x1d5   :  { %v576_v14 = vpop.f32.mrb[29].mxu0  ;;  %v656_v15 = vpop.f32.mrb[29].mxu1  ;;  %v968_v34 = vmul.f32 %v1616_v36, %v574_v12  ;;  %v984_v17 = vmul.f32 %v947_v16, %v654_v13 }
 0x1d7   :  { %1000 = vst [vmem:[#allocation2 + $0x70] sm:$0xff] %v968_v34  ;;  %1016 = vst [vmem:[#allocation2 + $0xf0] sm:$0xff] %v984_v17 }
 0x1d8   :  { %v579_v18 = vpop.f32.mrb[30].mxu0  ;;  %v659_v19 = vpop.f32.mrb[30].mxu1 }
 0x1d9   :  { %v581_v20 = vpop.f32.mrb[31].mxu0  ;;  %v661_v21 = vpop.f32.mrb[31].mxu1  ;;  %v969_v22 = vmul.f32 %v1618_v37, %v579_v18  ;;  %v985_v23 = vmul.f32 %v952_v35, %v659_v19 }
 0x1db   :  { %1001 = vst [vmem:[#allocation2 + $0x78] sm:$0xff] %v969_v22  ;;  %1017 = vst [vmem:[#allocation2 + $0xf8] sm:$0xff] %v985_v23 }
 0x1dc   :  { %1133 = shalt.err (!%p1130_p4)
}
 0x1dd   :  { %s1134_s26 = scalar_lea.hbm %s1646_s4, 4096 }
 0x1de   :  { %p1135_p5 = scmp.ne.s32.totalorder %s1646_s4, %s1134_s26  ;;  %p1138_p6 = scmp.lt.u32.totalorder %s1134_s26, %s1646_s4 }
 0x1e0   :  { %p1140_p7 = pnand %p1138_p6, %p1135_p5 }
 0x1e2   :  { %1143 = shalt.err (!%p1140_p7)
}
 0x1e3   :  { %s1149_s5 = smov 128   ;;  %s1150_s6 = smov 8  }
 0x1e4   :  { %1029 = dma.vmem_to_hbm [thread:$0]  %s1024_s1, 4096, %s1646_s4, [#allocation3], %s1149_s5, %s1149_s5, %s1150_s6  }
 0x1e5   :  { %1144 = dma.done.wait [#allocation3], 4096  }
 0x1e6   :  { %1145 = vsyncadd [#allocation3], 4294963200 }
 0x1e7   :  { %1033 = vsyncpa [#allocation3], 1 }

</bundles_post_ra>
